<compile_context>
chip_gen: v6e
topology: v6e:2x2x1
jax: 0.10.0
libtpu: 0.0.40
codegen_flags: <defaults>
</compile_context>

<pallas_src>
import jax
import jax.numpy as jnp
from jax.experimental import pallas as pl
from jax.experimental.pallas import tpu as pltpu

THRESH = 1.0  # HeavisideBoxcarCall(thresh=1.0)

_TARGET_BLOCK_ELEMS = 256 * 1024      # ~1 MiB per f32 array block
_VMEM_LIMIT_BYTES = 32 * 1024 * 1024  # safe on v5e (128 MiB), v6e (128 MiB), v7x (64 MiB)


def _sublane_count(dtype):
    itemsize = jnp.dtype(dtype).itemsize
    return (4 // itemsize) * 8  # 8 for 32-bit, 16 for 16-bit, 32 for 8-bit


def _plan_layout(n, dtype):
    """Pick lane width W and row count so the flat array reshapes to (rows, W).

    Prefers wide, pad-free layouts; falls back to W=128 with a small pad.
    Returns (W, rows, pad_elems)."""
    sub = _sublane_count(dtype)
    for w in (1024, 512, 256, 128):
        if n % (w * sub) == 0:
            return w, n // w, 0
    w = 128
    padded = pl.cdiv(n, w * sub) * (w * sub)
    return w, padded // w, padded - n


def _pick_tile(rows, w, dtype):
    sub = _sublane_count(dtype)
    tile = max(sub, (_TARGET_BLOCK_ELEMS // w) // sub * sub)
    return min(rows, tile)


# ---------------------------------------------------------------------------
# Single-step kernels (matches LIF_Node.forward exactly)
# ---------------------------------------------------------------------------

def _lif_kernel_scalar_decay(dec_ref, mem_ref, sb_ref, iin_ref,
                             mem_out_ref, spk_out_ref):
    d = dec_ref[0]  # scalar decay from SMEM, broadcast for free
    new_mem = mem_ref[...] * d * (1.0 - sb_ref[...]) + iin_ref[...]
    mem_out_ref[...] = new_mem
    # Boxcar forward: strict '>' against thresh, cast to float
    # (matches torch `input.gt(thresh).float()`).
    spk_out_ref[...] = (new_mem > THRESH).astype(new_mem.dtype)


def _lif_kernel_tensor_decay(mem_ref, sb_ref, dec_ref, iin_ref,
                             mem_out_ref, spk_out_ref):
    new_mem = mem_ref[...] * dec_ref[...] * (1.0 - sb_ref[...]) + iin_ref[...]
    mem_out_ref[...] = new_mem
    spk_out_ref[...] = (new_mem > THRESH).astype(new_mem.dtype)


def lif_node(mem, spike_before, decay, I_in):
    """Elementwise LIF membrane update. Returns (new_mem, spike), both mem.shape/dtype."""
    orig_shape = mem.shape
    dtype = mem.dtype
    n = int(mem.size)

    decay = jnp.asarray(decay, dtype=dtype)
    scalar_decay = int(decay.size) == 1

    w, rows, pad = _plan_layout(n, dtype)
    tile = _pick_tile(rows, w, dtype)
    grid = (pl.cdiv(rows, tile),)  # partial last block handled by grid masking

    def to_slab(x):
        x = jnp.broadcast_to(jnp.asarray(x, dtype=dtype), orig_shape).reshape(-1)
        if pad:
            x = jnp.pad(x, (0, pad))
        return x.reshape(rows, w)

    mem2 = to_slab(mem)
    sb2 = to_slab(spike_before)
    iin2 = to_slab(I_in)

    blk = pl.BlockSpec((tile, w), lambda i: (i, 0))
    out_shapes = (jax.ShapeDtypeStruct((rows, w), dtype),
                  jax.ShapeDtypeStruct((rows, w), dtype))
    cparams = pltpu.CompilerParams(
        dimension_semantics=("parallel",),
        vmem_limit_bytes=_VMEM_LIMIT_BYTES)

    if scalar_decay:
        mem_out, spk_out = pl.pallas_call(
            _lif_kernel_scalar_decay,
            out_shape=out_shapes,
            grid_spec=pltpu.PrefetchScalarGridSpec(
                num_scalar_prefetch=0,
                grid=grid,
                in_specs=[pl.BlockSpec(memory_space=pltpu.MemorySpace.SMEM),
                          blk, blk, blk],
                out_specs=(blk, blk)),
            compiler_params=cparams,
        )(decay.reshape(1), mem2, sb2, iin2)
    else:
        dec2 = to_slab(decay)
        mem_out, spk_out = pl.pallas_call(
            _lif_kernel_tensor_decay,
            out_shape=out_shapes,
            grid_spec=pltpu.PrefetchScalarGridSpec(
                num_scalar_prefetch=0,
                grid=grid,
                in_specs=[blk, blk, blk, blk],
                out_specs=(blk, blk)),
            compiler_params=cparams,
        )(mem2, sb2, dec2, iin2)

    if pad:
        mem_out = mem_out.reshape(-1)[:n]
        spk_out = spk_out.reshape(-1)[:n]
    return mem_out.reshape(orig_shape), spk_out.reshape(orig_shape)


# ---------------------------------------------------------------------------
# Fused multi-timestep kernel: state stays resident in VMEM across T.
# Equivalent to calling LIF_Node.forward T times in a loop.
# ---------------------------------------------------------------------------

def _lif_seq_kernel(dec_ref, mem0_ref, spk0_ref, iin_ref,
                    mem_ref, spikes_ref, spk_sc):
    t = pl.program_id(1)

    @pl.when(t == 0)
    def _init():
        mem_ref[...] = mem0_ref[...]    # mem_ref block is resident across the T axis
        spk_sc[...] = spk0_ref[...]

    d = dec_ref[0]
    new_mem = mem_ref[...] * d * (1.0 - spk_sc[...]) + iin_ref[0]
    new_spk = (new_mem > THRESH).astype(new_mem.dtype)
    mem_ref[...] = new_mem
    spk_sc[...] = new_spk
    spikes_ref[0] = new_spk


def lif_node_sequence(mem0, spike0, decay, I_seq):
    """Run T LIF steps with membrane/spike state held in VMEM.

    I_seq: (T, *state_shape). Returns (final_mem, spikes) with spikes (T, *state_shape).
    """
    T = int(I_seq.shape[0])
    state_shape = mem0.shape
    dtype = mem0.dtype
    n = int(mem0.size)

    decay = jnp.asarray(decay, dtype=dtype)
    assert int(decay.size) == 1, "lif_node_sequence currently supports scalar decay"
    # TODO(synk): tensor decay in the fused-T kernel needs one more resident VMEM block.

    w, rows, pad = _plan_layout(n, dtype)
    tile = _pick_tile(rows, w, dtype)
    row_tiles = pl.cdiv(rows, tile)

    def to_slab(x):
        x = jnp.broadcast_to(jnp.asarray(x, dtype=dtype), state_shape).reshape(-1)
        if pad:
            x = jnp.pad(x, (0, pad))
        return x.reshape(rows, w)

    mem0_2 = to_slab(mem0)
    spk0_2 = to_slab(spike0)
    iin = I_seq.reshape(T, -1).astype(dtype)
    if pad:
        iin = jnp.pad(iin, ((0, 0), (0, pad)))
    iin = iin.reshape(T, rows, w)

    state_blk = pl.BlockSpec((tile, w), lambda i, t: (i, 0))        # resident over T
    seq_blk = pl.BlockSpec((1, tile, w), lambda i, t: (t, i, 0))    # streamed per step

    mem_T, spikes = pl.pallas_call(
        _lif_seq_kernel,
        out_shape=(jax.ShapeDtypeStruct((rows, w), dtype),
                   jax.ShapeDtypeStruct((T, rows, w), dtype)),
        grid_spec=pltpu.PrefetchScalarGridSpec(
            num_scalar_prefetch=0,
            grid=(row_tiles, T),
            in_specs=[pl.BlockSpec(memory_space=pltpu.MemorySpace.SMEM),
                      state_blk, state_blk, seq_blk],
            out_specs=(state_blk, seq_blk),
            scratch_shapes=[pltpu.VMEM((tile, w), dtype)]),
        compiler_params=pltpu.CompilerParams(
            dimension_semantics=("parallel", "arbitrary"),
            vmem_limit_bytes=_VMEM_LIMIT_BYTES),
    )(decay.reshape(1), mem0_2, spk0_2, iin)

    if pad:
        mem_T = mem_T.reshape(-1)[:n]
        spikes = spikes.reshape(T, -1)[:, :n]
    return mem_T.reshape(state_shape), spikes.reshape((T,) + state_shape)


if __name__ == "__main__":
    # Small NCHW shapes consistent with a conv-SNN layer state.
    B, C, H, W = 2, 4, 16, 16
    key = jax.random.PRNGKey(0)
    k1, k2, k3, k4, k5 = jax.random.split(key, 5)

    # --- Test 1: module-shaped inputs, full-tensor decay ---------------------
    mem = jax.random.normal(k1, (B, C, H, W), dtype=jnp.float32)
    spike_before = (jax.random.uniform(k2, (B, C, H, W)) > 0.5).astype(jnp.float32)
    decay = jax.random.uniform(k3, (B, C, H, W), dtype=jnp.float32)
    I_in = jax.random.normal(k4, (B, C, H, W), dtype=jnp.float32)

    mem_out, spike_out = lif_node(mem, spike_before, decay, I_in)
    jax.block_until_ready((mem_out, spike_out))

    ref_mem = mem * decay * (1.0 - spike_before) + I_in
    ref_spike = (ref_mem > THRESH).astype(jnp.float32)
    assert jnp.allclose(mem_out, ref_mem, atol=1e-6)
    assert jnp.array_equal(spike_out, ref_spike)

    # --- Test 2: multi-tile + ragged tail + SCALAR decay (SMEM path) ---------
    n_big = 3 * 1024 * 128 + 577   # misaligned size: pad + partial last block
    mem_b = jax.random.normal(k1, (n_big,), dtype=jnp.float32)
    sb_b = (jax.random.uniform(k2, (n_big,)) > 0.5).astype(jnp.float32)
    decay_b = jnp.float32(0.7)     # scalar decay -> SMEM, no broadcast materialized
    iin_b = jax.random.normal(k4, (n_big,), dtype=jnp.float32)
    mo_b, sp_b = lif_node(mem_b, sb_b, decay_b, iin_b)
    jax.block_until_ready((mo_b, sp_b))
    ref_mb = mem_b * decay_b * (1.0 - sb_b) + iin_b
    assert jnp.allclose(mo_b, ref_mb, atol=1e-6)
    assert jnp.array_equal(sp_b, (ref_mb > THRESH).astype(jnp.float32))

    # --- Test 3: fused timestep loop (state resident in VMEM) ----------------
    T = 8
    I_seq = jax.random.normal(k5, (T, B, C, H, W), dtype=jnp.float32)
    mem0 = jnp.zeros((B, C, H, W), jnp.float32)
    spk0 = jnp.zeros((B, C, H, W), jnp.float32)
    dec_s = jnp.float32(0.5)
    mem_T, spikes = lif_node_sequence(mem0, spk0, dec_s, I_seq)
    jax.block_until_ready((mem_T, spikes))

    m_ref, s_ref = mem0, spk0
    ref_spk_seq = []
    for t in range(T):
        m_ref = m_ref * dec_s * (1.0 - s_ref) + I_seq[t]
        s_ref = (m_ref > THRESH).astype(jnp.float32)
        ref_spk_seq.append(s_ref)
    ref_spk_seq = jnp.stack(ref_spk_seq)
    assert jnp.allclose(mem_T, m_ref, atol=1e-5)
    assert jnp.array_equal(spikes, ref_spk_seq)

    print("KERNEL_OK")
</pallas_src>

<mosaic_0001>
module attributes {stable_mosaic.version = 11 : i64} {
  func.func @_lif_kernel_tensor_decay(%arg0: i32, %arg1: memref<8x256xf32, #tpu.memory_space<vmem>>, %arg2: memref<8x256xf32, #tpu.memory_space<vmem>>, %arg3: memref<8x256xf32, #tpu.memory_space<vmem>>, %arg4: memref<8x256xf32, #tpu.memory_space<vmem>>, %arg5: memref<8x256xf32, #tpu.memory_space<vmem>>, %arg6: memref<8x256xf32, #tpu.memory_space<vmem>>) attributes {dimension_semantics = [#tpu.dimension_semantics<parallel>], iteration_bounds = array<i64: 1>, scalar_prefetch = 0 : i64, scratch_operands = 0 : i64, tpu.core_type = #tpu.core_type<tc>, window_params = [{transform_indices = @transform_0, window_bounds = array<i64: 8, 256>}, {transform_indices = @transform_1, window_bounds = array<i64: 8, 256>}, {transform_indices = @transform_2, window_bounds = array<i64: 8, 256>}, {transform_indices = @transform_3, window_bounds = array<i64: 8, 256>}, {transform_indices = @transform_4, window_bounds = array<i64: 8, 256>}, {transform_indices = @transform_5, window_bounds = array<i64: 8, 256>}]} {
    %c0 = arith.constant 0 : index
    %c0_0 = arith.constant 0 : index
    %0 = vector.load %arg1[%c0, %c0_0] : memref<8x256xf32, #tpu.memory_space<vmem>>, vector<8x256xf32>
    %c0_1 = arith.constant 0 : index
    %c0_2 = arith.constant 0 : index
    %1 = vector.load %arg3[%c0_1, %c0_2] : memref<8x256xf32, #tpu.memory_space<vmem>>, vector<8x256xf32>
    %2 = arith.mulf %0, %1 : vector<8x256xf32>
    %c0_3 = arith.constant 0 : index
    %c0_4 = arith.constant 0 : index
    %3 = vector.load %arg2[%c0_3, %c0_4] : memref<8x256xf32, #tpu.memory_space<vmem>>, vector<8x256xf32>
    %cst = arith.constant 1.000000e+00 : f32
    %4 = vector.broadcast %cst : f32 to vector<8x256xf32>
    %5 = arith.subf %4, %3 : vector<8x256xf32>
    %6 = arith.mulf %2, %5 : vector<8x256xf32>
    %c0_5 = arith.constant 0 : index
    %c0_6 = arith.constant 0 : index
    %7 = vector.load %arg4[%c0_5, %c0_6] : memref<8x256xf32, #tpu.memory_space<vmem>>, vector<8x256xf32>
    %8 = arith.addf %6, %7 : vector<8x256xf32>
    %c0_7 = arith.constant 0 : index
    %c0_8 = arith.constant 0 : index
    %9 = vector.load %arg5[%c0_7, %c0_8] : memref<8x256xf32, #tpu.memory_space<vmem>>, vector<8x256xf32>
    tpu.vector_store %arg5[%c0_7, %c0_8], %8 {strides = array<i32>} : memref<8x256xf32, #tpu.memory_space<vmem>>, vector<8x256xf32>,
    %cst_9 = arith.constant 1.000000e+00 : f32
    %10 = vector.broadcast %cst_9 : f32 to vector<8x256xf32>
    %11 = arith.cmpf ogt, %8, %10 : vector<8x256xf32>
    %12 = arith.extui %11 : vector<8x256xi1> to vector<8x256xi32>
    %13 = arith.sitofp %12 : vector<8x256xi32> to vector<8x256xf32>
    %c0_10 = arith.constant 0 : index
    %c0_11 = arith.constant 0 : index
    %14 = vector.load %arg6[%c0_10, %c0_11] : memref<8x256xf32, #tpu.memory_space<vmem>>, vector<8x256xf32>
    tpu.vector_store %arg6[%c0_10, %c0_11], %13 {strides = array<i32>} : memref<8x256xf32, #tpu.memory_space<vmem>>, vector<8x256xf32>,
    return
  }
  func.func @transform_0(%arg0: i32) -> (i32, i32) {
    %c0_i32 = arith.constant 0 : i32
    %c0_i32_0 = arith.constant 0 : i32
    return %arg0, %c0_i32 : i32, i32
  }
  func.func @transform_1(%arg0: i32) -> (i32, i32) {
    %c0_i32 = arith.constant 0 : i32
    %c0_i32_0 = arith.constant 0 : i32
    return %arg0, %c0_i32 : i32, i32
  }
  func.func @transform_2(%arg0: i32) -> (i32, i32) {
    %c0_i32 = arith.constant 0 : i32
    %c0_i32_0 = arith.constant 0 : i32
    return %arg0, %c0_i32 : i32, i32
  }
  func.func @transform_3(%arg0: i32) -> (i32, i32) {
    %c0_i32 = arith.constant 0 : i32
    %c0_i32_0 = arith.constant 0 : i32
    return %arg0, %c0_i32 : i32, i32
  }
  func.func @transform_4(%arg0: i32) -> (i32, i32) {
    %c0_i32 = arith.constant 0 : i32
    %c0_i32_0 = arith.constant 0 : i32
    return %arg0, %c0_i32 : i32, i32
  }
  func.func @transform_5(%arg0: i32) -> (i32, i32) {
    %c0_i32 = arith.constant 0 : i32
    %c0_i32_0 = arith.constant 0 : i32
    return %arg0, %c0_i32 : i32, i32
  }
}

</mosaic_0001>

<bundles_post_ra>
// kernel: tpu_custom_call.1
= control target key start
LH: loop header
LB: loop body
LE: loop exit
PB: predicated region body
PF: predicated region fallthrough
CT: control target
= control target key end

     0   :  { %11 = vsyncpa [#allocation3], 0  ;;  %s319_s0 = inlined_call_operand.hbm [shape: f32[8,256], index: 0, kind: input, shape index: {}]   ;;  %s320_s1 = inlined_call_operand.hbm [shape: f32[8,256], index: 1, kind: input, shape index: {}]   ;;  %s321_s2 = inlined_call_operand.hbm [shape: f32[8,256], index: 2, kind: input, shape index: {}]   ;;  %s322_s3 = inlined_call_operand.hbm [shape: f32[8,256], index: 3, kind: input, shape index: {}]   ;;  %s323_s4 = inlined_call_operand.hbm [shape: f32[8,256], index: 4, kind: output, shape index: {0}]   ;;  %s324_s5 = inlined_call_operand.hbm [shape: f32[8,256], index: 5, kind: output, shape index: {1}]  }
   0x1   :  { %12 = vsyncpa [#allocation6], 0 }
   0x2   :  { %13 = vsyncpa [#allocation9], 0 }
   0x3   :  { %14 = vsyncpa [#allocation4], 0 }
   0x4   :  { %15 = vsyncpa [#allocation12], 0  ;;  %s264_s18 = smov [#allocation5]   ;;  %s265_s20 = smov [#allocation2]  }
   0x5   :  { %s32_s19 = sshll.u32 %s264_s18, 4  ;;  %s22_s21 = sshll.u32 %s265_s20, 4  ;;  %s33_s19 = int_to_ptr.vmem [resolvable:$true] %s32_s19  ;;  %s23_s21 = int_to_ptr.vmem [resolvable:$true] %s22_s21 }
   0x6   :  { %s142_s22 = scalar_lea.vmem %s33_s19, 256  ;;  %p147_p1 = scmp.lt.s32.totalorder %s33_s19, %s33_s19 }
   0x7   :  { %p143_p0 = scmp.ne.s32.totalorder %s33_s19, %s142_s22  ;;  %p148_p2 = scmp.lt.s32.totalorder %s142_s22, %s142_s22 }
   0x9   :  { %p149_p3 = por %p148_p2, %p147_p1 }
   0xb   :  { %p150_p4 = pnand %p149_p3, %p143_p0 }
   0xd   :  { %153 = shalt.err (!%p150_p4)
}
   0xe   :  { %35 = dma.hbm_to_vmem [thread:$0]  %s320_s1, 256, %s33_s19, [#allocation6]  }
   0xf   :  { %s162_s25 = scalar_lea.vmem %s23_s21, 256  ;;  %p167_p6 = scmp.lt.s32.totalorder %s23_s21, %s23_s21 }
  0x10   :  { %p163_p5 = scmp.ne.s32.totalorder %s23_s21, %s162_s25  ;;  %p168_p7 = scmp.lt.s32.totalorder %s162_s25, %s162_s25 }
  0x12   :  { %p169_p8 = por %p168_p7, %p167_p6 }
  0x14   :  { %p170_p9 = pnand %p169_p8, %p163_p5 }
  0x16   :  { %173 = shalt.err (!%p170_p9)
}
  0x17   :  { %25 = dma.hbm_to_vmem [thread:$0]  %s319_s0, 256, %s23_s21, [#allocation3]  }
  0x18   :  { %s266_s28 = smov [#allocation7]   ;;  %s267_s30 = smov [#allocation8]  }
  0x19   :  { %s42_s29 = sshll.u32 %s266_s28, 4  ;;  %s52_s6 = sshll.u32 %s267_s30, 4  ;;  %s43_s29 = int_to_ptr.vmem [resolvable:$true] %s42_s29  ;;  %s53_s6 = int_to_ptr.vmem [resolvable:$true] %s52_s6 }
  0x1a   :  { %s182_s7 = scalar_lea.vmem %s43_s29, 256  ;;  %p187_p11 = scmp.lt.s32.totalorder %s43_s29, %s43_s29 }
  0x1b   :  { %p183_p10 = scmp.ne.s32.totalorder %s43_s29, %s182_s7  ;;  %p188_p12 = scmp.lt.s32.totalorder %s182_s7, %s182_s7 }
  0x1d   :  { %p189_p13 = por %p188_p12, %p187_p11 }
  0x1f   :  { %p190_p0 = pnand %p189_p13, %p183_p10 }
  0x21   :  { %193 = shalt.err (!%p190_p0)
}
  0x22   :  { %45 = dma.hbm_to_vmem [thread:$0]  %s321_s2, 256, %s43_s29, [#allocation6]  }
  0x23   :  { %s202_s9 = scalar_lea.vmem %s53_s6, 256  ;;  %p207_p2 = scmp.lt.s32.totalorder %s53_s6, %s53_s6 }
  0x24   :  { %p203_p1 = scmp.ne.s32.totalorder %s53_s6, %s202_s9  ;;  %p208_p3 = scmp.lt.s32.totalorder %s202_s9, %s202_s9 }
  0x26   :  { %p209_p4 = por %p208_p3, %p207_p2 }
  0x28   :  { %p210_p5 = pnand %p209_p4, %p203_p1 }
  0x2a   :  { %213 = shalt.err (!%p210_p5)
}
  0x2b   :  { %55 = dma.hbm_to_vmem [thread:$0]  %s322_s3, 256, %s53_s6, [#allocation9]  }
  0x2c   :  { %254 = dma.done.wait [#allocation3], 256  }
  0x2d   :  { %255 = vsyncadd [#allocation3], 4294967040 }
  0x2e   :  { %256 = dma.done.wait [#allocation6], 512  }
  0x2f   :  { %257 = vsyncadd [#allocation6], 4294966784 }
  0x30   :  { %258 = dma.done.wait [#allocation9], 256  }
  0x31   :  { %259 = vsyncadd [#allocation9], 4294967040  ;;  %v68_v0 = vld [vmem:[#allocation2] sm:$0xff]  ;;  %v74_v2 = vld [vmem:[#allocation5] sm:$0xff]  ;;  %s268_s2 = smov [#allocation10]   ;;  %s269_s11 = smov [#allocation11]  }
  0x32   :  { %v70_v1 = vld [vmem:[#allocation7] sm:$0xff]  ;;  %v76_v4 = vsub.f32 1.0, %v74_v2  ;;  %v69_v5 = vld [vmem:[#allocation2 + $0x8] sm:$0xff]  ;;  %v80_v7 = vld [vmem:[#allocation8] sm:$0xff]  ;;  %s100_s3 = sshll.u32 %s268_s2, 4  ;;  %s110_s12 = sshll.u32 %s269_s11, 4  ;;  %s101_s3 = int_to_ptr.vmem [resolvable:$true] %s100_s3  ;;  %s111_s12 = int_to_ptr.vmem [resolvable:$true] %s110_s12 }
  0x33   :  { %v72_v3 = vmul.f32 %v70_v1, %v68_v0  ;;  %v71_v6 = vld [vmem:[#allocation7 + $0x8] sm:$0xff]  ;;  %v75_v9 = vld [vmem:[#allocation5 + $0x8] sm:$0xff]  ;;  %v270_v16 = vmov 0.0   ;;  %s214_s13 = scalar_lea.vmem %s101_s3, 256  ;;  %p219_p7 = scmp.lt.s32.totalorder %s101_s3, %s101_s3 }
  0x34   :  { %v73_v8 = vmul.f32 %v71_v6, %v69_v5  ;;  %v77_v11 = vsub.f32 1.0, %v75_v9  ;;  %v81_v12 = vld [vmem:[#allocation8 + $0x8] sm:$0xff]  ;;  %p215_p6 = scmp.ne.s32.totalorder %s101_s3, %s214_s13  ;;  %p220_p8 = scmp.lt.s32.totalorder %s214_s13, %s214_s13 }
  0x35   :  { %v78_v10 = vmul.f32 %v76_v4, %v72_v3 }
  0x36   :  { %v79_v14 = vmul.f32 %v77_v11, %v73_v8  ;;  %p221_p9 = por %p220_p8, %p219_p7 }
  0x37   :  { %v82_v13 = vadd.f32 %v80_v7, %v78_v10 }
  0x38   :  { %v83_v15 = vadd.f32 %v81_v12, %v79_v14  ;;  %p222_p10 = pnand %p221_p9, %p215_p6 }
  0x39   :  { %84 = vst [vmem:[#allocation10] sm:$0xff] %v82_v13  ;;  %vm86_vm0 = vcmp.gt.f32.partialorder %v82_v13, 1.0 }
  0x3a   :  { %v125_v17 = vsel %vm86_vm0, 1.0, %v270_v16  ;;  %85 = vst [vmem:[#allocation10 + $0x8] sm:$0xff] %v83_v15  ;;  %vm87_vm1 = vcmp.gt.f32.partialorder %v83_v15, 1.0 }
  0x3b   :  { %92 = vst [vmem:[#allocation11] sm:$0xff] %v125_v17  ;;  %v126_v18 = vsel %vm87_vm1, 1.0, %v270_v16 }
  0x3c   :  { %225 = shalt.err (!%p222_p10)
}
  0x3d   :  { %103 = dma.vmem_to_hbm [thread:$0]  %s101_s3, 256, %s323_s4, [#allocation4]   ;;  %93 = vst [vmem:[#allocation11 + $0x8] sm:$0xff] %v126_v18 }
  0x3e   :  { %s234_s16 = scalar_lea.vmem %s111_s12, 256  ;;  %p239_p12 = scmp.lt.s32.totalorder %s111_s12, %s111_s12 }
  0x3f   :  { %p235_p11 = scmp.ne.s32.totalorder %s111_s12, %s234_s16  ;;  %p240_p13 = scmp.lt.s32.totalorder %s234_s16, %s234_s16 }
  0x41   :  { %p241_p0 = por %p240_p13, %p239_p12 }
  0x43   :  { %p242_p1 = pnand %p241_p0, %p235_p11 }
  0x45   :  { %245 = shalt.err (!%p242_p1)
}
  0x46   :  { %113 = dma.vmem_to_hbm [thread:$0]  %s111_s12, 256, %s324_s5, [#allocation12]  }
  0x47   :  { %260 = dma.done.wait [#allocation4], 256  }
  0x48   :  { %261 = vsyncadd [#allocation4], 4294967040 }
  0x49   :  { %262 = dma.done.wait [#allocation12], 256  }
  0x4a   :  { %263 = vsyncadd [#allocation12], 4294967040 }
  0x4b   :  { %120 = vsyncpa [#allocation3], 1 }
  0x4c   :  { %121 = vsyncpa [#allocation6], 1 }
  0x4d   :  { %122 = vsyncpa [#allocation9], 1 }
  0x4e   :  { %123 = vsyncpa [#allocation4], 1 }
  0x4f   :  { %124 = vsyncpa [#allocation12], 1 }

</bundles_post_ra>
